<compile_context>
chip_gen: v6e
topology: v6e:2x2x1
jax: 0.10.0
libtpu: 0.0.40
codegen_flags: <defaults>
</compile_context>

<pallas_src>
import jax
import jax.numpy as jnp
from jax.experimental import pallas as pl
from jax.experimental.pallas import tpu as pltpu

WIDTH = 20
BLOCKS = 3
TM_MAX = 4096   # upper bound on the batch tile (lanes per grid step)

# misc slab column layout: (WIDTH, 5 + 2*BLOCKS)
#   col 0,1 : pre_layer weight columns (for x and t)
#   col 2   : pre_layer bias
#   col 3   : last_layer weight (WIDTH -> 1 column vector)
#   col 4   : last_layer bias (scalar stored at row 0)
#   cols 5 .. 5+BLOCKS-1          : b1_j (layerOp1 biases)
#   cols 5+BLOCKS .. 5+2*BLOCKS-1 : b2_j (layerOp2 biases)
_MISC_COLS = 5 + 2 * BLOCKS


def burgers_dnn_kernel(xt_ref, w_ref, misc_ref, out_ref):
    # xt_ref: (2, TM) -- row 0 = x batch, row 1 = t batch (batch on lanes)
    x_row = xt_ref[0:1, :]                       # (1, TM)
    t_row = xt_ref[1:2, :]                       # (1, TM)

    # pre_layer + tanh on the VPU: K=2 matmul -> two broadcast FMAs.
    u = jnp.tanh(misc_ref[:, 0:1] * x_row
                 + misc_ref[:, 1:2] * t_row
                 + misc_ref[:, 2:3])             # (WIDTH, TM)

    # residual blocks on the MXU (static Python loop; BLOCKS is small & fixed)
    # w_ref: (2*BLOCKS, WIDTH, WIDTH), index 2j = W1_j, 2j+1 = W2_j
    for j in range(BLOCKS):
        b1 = misc_ref[:, 5 + j:6 + j]                        # (WIDTH, 1)
        b2 = misc_ref[:, 5 + BLOCKS + j:6 + BLOCKS + j]      # (WIDTH, 1)
        h = jnp.tanh(
            jnp.dot(w_ref[2 * j], u, preferred_element_type=jnp.float32) + b1
        )
        u = jnp.tanh(
            jnp.dot(w_ref[2 * j + 1], h, preferred_element_type=jnp.float32) + b2
        ) + u

    # last_layer (bc == 'train'): out_features = 1 -> elementwise multiply +
    # cross-sublane reduce (XLU) instead of an MXU pass.  Lane-dense store.
    last_w = misc_ref[:, 3:4]                    # (WIDTH, 1)
    last_b = misc_ref[0:1, 4:5]                  # (1, 1)
    out_ref[...] = jnp.sum(last_w * u, axis=0, keepdims=True) + last_b


def init_params(key, width=WIDTH, blocks=BLOCKS):
    """Deterministic synthetic parameters in (out, in) / column-bias order."""
    ks = jax.random.split(key, 8)
    scale = 0.5
    return {
        "pre_w": scale * jax.random.normal(ks[0], (width, 2), jnp.float32),
        "pre_b": scale * jax.random.normal(ks[1], (width, 1), jnp.float32),
        "w1": scale * jax.random.normal(ks[2], (blocks, width, width), jnp.float32),
        "b1": scale * jax.random.normal(ks[3], (blocks, width, 1), jnp.float32),
        "w2": scale * jax.random.normal(ks[4], (blocks, width, width), jnp.float32),
        "b2": scale * jax.random.normal(ks[5], (blocks, width, 1), jnp.float32),
        "last_w": scale * jax.random.normal(ks[6], (width, 1), jnp.float32),
        "last_b": scale * jax.random.normal(ks[7], (1, 1), jnp.float32),
    }


def _pack_params(params):
    """Pack the 8 small parameter arrays into 2 slabs (fused away under jit)."""
    # Interleave W1_j / W2_j -> (2*BLOCKS, WIDTH, WIDTH)
    w_blocks = jnp.stack([params["w1"], params["w2"]], axis=1).reshape(
        2 * BLOCKS, WIDTH, WIDTH)
    last_b_col = jnp.zeros((WIDTH, 1), jnp.float32).at[0, 0].set(
        params["last_b"][0, 0])
    b1_cols = jnp.transpose(params["b1"][:, :, 0])   # (WIDTH, BLOCKS)
    b2_cols = jnp.transpose(params["b2"][:, :, 0])   # (WIDTH, BLOCKS)
    misc = jnp.concatenate(
        [params["pre_w"], params["pre_b"], params["last_w"], last_b_col,
         b1_cols, b2_cols], axis=1)                  # (WIDTH, 5 + 2*BLOCKS)
    return w_blocks, misc


def _pick_tm(n):
    """Batch tile: as large as possible (<=4096) while keeping >=2 grid steps
    whenever n > 512, so both TensorCores are used on v7x."""
    n512 = max(512, ((n + 511) // 512) * 512)
    half = (n512 // 2 // 512) * 512              # round down n512/2 to x512
    return max(512, min(TM_MAX, half))


@jax.jit
def burgers_dnn_forward(x, t, params):
    """x, t: (N, 1) float32. Returns u: (N, 1) float32."""
    n = x.shape[0]
    tm = _pick_tm(n)
    n_pad = ((n + tm - 1) // tm) * tm
    grid = (n_pad // tm,)

    # Dense-lane (2, n_pad) input slab (batch on lanes).
    xt_t = jnp.concatenate([x.T, t.T], axis=0)            # (2, N)
    if n_pad != n:
        xt_t = jnp.pad(xt_t, ((0, 0), (0, n_pad - n)))     # (2, n_pad)

    w_blocks, misc = _pack_params(params)

    out = pl.pallas_call(
        burgers_dnn_kernel,
        out_shape=jax.ShapeDtypeStruct((1, n_pad), jnp.float32),
        grid_spec=pltpu.PrefetchScalarGridSpec(
            num_scalar_prefetch=0,
            grid=grid,
            in_specs=[
                pl.BlockSpec((2, tm), lambda i: (0, i)),             # xt tile
                pl.BlockSpec((2 * BLOCKS, WIDTH, WIDTH),
                             lambda i: (0, 0, 0)),                   # weights
                pl.BlockSpec((WIDTH, _MISC_COLS), lambda i: (0, 0)),  # misc
            ],
            out_specs=pl.BlockSpec((1, tm), lambda i: (0, i)),       # lane-dense
        ),
        compiler_params=pltpu.CompilerParams(
            dimension_semantics=("parallel",)
        ),
    )(xt_t, w_blocks, misc)

    # (1, n_pad) -> (N, 1)
    return out[0, :n].reshape(n, 1)


def reference_forward(x, t, params):
    """Pure-JAX reference mirroring the torch module (batch-major layout)."""
    u = jnp.concatenate([x, t], axis=1)                    # (N, 2)
    u = jnp.tanh(u @ params["pre_w"].T + params["pre_b"].T)
    for j in range(BLOCKS):
        h = jnp.tanh(u @ params["w1"][j].T + params["b1"][j].T)
        u = jnp.tanh(h @ params["w2"][j].T + params["b2"][j].T) + u
    return u @ params["last_w"] + params["last_b"]


if __name__ == "__main__":
    key = jax.random.PRNGKey(0)
    kp, kx, kt = jax.random.split(key, 3)

    params = init_params(kp)

    N = 1000  # collocation points; pads to 2 tiles of TM=512 (2-step grid)
    x = jax.random.uniform(kx, (N, 1), jnp.float32, minval=-1.0, maxval=1.0)
    t = jax.random.uniform(kt, (N, 1), jnp.float32, minval=0.0, maxval=1.0)

    u = burgers_dnn_forward(x, t, params)
    u = jax.block_until_ready(u)

    u_ref = reference_forward(x, t, params)
    assert u.shape == (N, 1)
    assert jnp.allclose(u, u_ref, atol=1e-5, rtol=1e-5), "mismatch vs reference"

    print("KERNEL_OK")
</pallas_src>

<mosaic_0001>
module attributes {stable_mosaic.version = 11 : i64} {
  func.func @burgers_dnn_kernel(%arg0: i32, %arg1: memref<2x512xf32, #tpu.memory_space<vmem>>, %arg2: memref<6x20x20xf32, #tpu.memory_space<vmem>>, %arg3: memref<20x11xf32, #tpu.memory_space<vmem>>, %arg4: memref<1x512xf32, #tpu.memory_space<vmem>>) attributes {dimension_semantics = [#tpu.dimension_semantics<parallel>], iteration_bounds = array<i64: 2>, scalar_prefetch = 0 : i64, scratch_operands = 0 : i64, tpu.core_type = #tpu.core_type<tc>, window_params = [{transform_indices = @transform_0, window_bounds = array<i64: 2, 512>}, {pipeline_mode = #tpu.pipeline_mode<synchronous>, transform_indices = @transform_1, window_bounds = array<i64: 6, 20, 20>}, {pipeline_mode = #tpu.pipeline_mode<synchronous>, transform_indices = @transform_2, window_bounds = array<i64: 20, 11>}, {transform_indices = @transform_3, window_bounds = array<i64: 1, 512>}]} {
    %c0 = arith.constant 0 : index
    %c0_0 = arith.constant 0 : index
    %0 = vector.load %arg1[%c0, %c0_0] : memref<2x512xf32, #tpu.memory_space<vmem>>, vector<1x512xf32>
    %c1 = arith.constant 1 : index
    %c0_1 = arith.constant 0 : index
    %1 = vector.load %arg1[%c1, %c0_1] : memref<2x512xf32, #tpu.memory_space<vmem>>, vector<1x512xf32>
    %c0_2 = arith.constant 0 : index
    %c0_3 = arith.constant 0 : index
    %2 = vector.load %arg3[%c0_2, %c0_3] : memref<20x11xf32, #tpu.memory_space<vmem>>, vector<20x1xf32>
    %3 = vector.broadcast %2 : vector<20x1xf32> to vector<20x512xf32>
    %4 = vector.broadcast %0 : vector<1x512xf32> to vector<20x512xf32>
    %5 = arith.mulf %3, %4 : vector<20x512xf32>
    %c0_4 = arith.constant 0 : index
    %c1_5 = arith.constant 1 : index
    %6 = vector.load %arg3[%c0_4, %c1_5] : memref<20x11xf32, #tpu.memory_space<vmem>>, vector<20x1xf32>
    %7 = vector.broadcast %6 : vector<20x1xf32> to vector<20x512xf32>
    %8 = vector.broadcast %1 : vector<1x512xf32> to vector<20x512xf32>
    %9 = arith.mulf %7, %8 : vector<20x512xf32>
    %10 = arith.addf %5, %9 : vector<20x512xf32>
    %c0_6 = arith.constant 0 : index
    %c2 = arith.constant 2 : index
    %11 = vector.load %arg3[%c0_6, %c2] : memref<20x11xf32, #tpu.memory_space<vmem>>, vector<20x1xf32>
    %12 = vector.broadcast %11 : vector<20x1xf32> to vector<20x512xf32>
    %13 = arith.addf %10, %12 : vector<20x512xf32>
    %14 = math.tanh %13 : vector<20x512xf32>
    %c0_7 = arith.constant 0 : index
    %c5 = arith.constant 5 : index
    %15 = vector.load %arg3[%c0_7, %c5] : memref<20x11xf32, #tpu.memory_space<vmem>>, vector<20x1xf32>
    %c0_8 = arith.constant 0 : index
    %c8 = arith.constant 8 : index
    %16 = vector.load %arg3[%c0_8, %c8] : memref<20x11xf32, #tpu.memory_space<vmem>>, vector<20x1xf32>
    %c0_9 = arith.constant 0 : index
    %c0_10 = arith.constant 0 : index
    %c0_11 = arith.constant 0 : index
    %17 = vector.load %arg2[%c0_9, %c0_10, %c0_11] : memref<6x20x20xf32, #tpu.memory_space<vmem>>, vector<1x20x20xf32>
    %18 = vector.shape_cast %17 : vector<1x20x20xf32> to vector<20x20xf32>
    %cst = arith.constant dense<0.000000e+00> : vector<20x512xf32>
    %19 = tpu.matmul %18, %14, %cst {dimension_numbers = #tpu.dot_dimension_numbers<[1], [0], [0], [1], [0, 0, 1, 1], [], []>} : vector<20x20xf32>, vector<20x512xf32>, vector<20x512xf32> -> vector<20x512xf32>
    %20 = vector.broadcast %15 : vector<20x1xf32> to vector<20x512xf32>
    %21 = arith.addf %19, %20 : vector<20x512xf32>
    %22 = math.tanh %21 : vector<20x512xf32>
    %c1_12 = arith.constant 1 : index
    %c0_13 = arith.constant 0 : index
    %c0_14 = arith.constant 0 : index
    %23 = vector.load %arg2[%c1_12, %c0_13, %c0_14] : memref<6x20x20xf32, #tpu.memory_space<vmem>>, vector<1x20x20xf32>
    %24 = vector.shape_cast %23 : vector<1x20x20xf32> to vector<20x20xf32>
    %cst_15 = arith.constant dense<0.000000e+00> : vector<20x512xf32>
    %25 = tpu.matmul %24, %22, %cst_15 {dimension_numbers = #tpu.dot_dimension_numbers<[1], [0], [0], [1], [0, 0, 1, 1], [], []>} : vector<20x20xf32>, vector<20x512xf32>, vector<20x512xf32> -> vector<20x512xf32>
    %26 = vector.broadcast %16 : vector<20x1xf32> to vector<20x512xf32>
    %27 = arith.addf %25, %26 : vector<20x512xf32>
    %28 = math.tanh %27 : vector<20x512xf32>
    %29 = arith.addf %28, %14 : vector<20x512xf32>
    %c0_16 = arith.constant 0 : index
    %c6 = arith.constant 6 : index
    %30 = vector.load %arg3[%c0_16, %c6] : memref<20x11xf32, #tpu.memory_space<vmem>>, vector<20x1xf32>
    %c0_17 = arith.constant 0 : index
    %c9 = arith.constant 9 : index
    %31 = vector.load %arg3[%c0_17, %c9] : memref<20x11xf32, #tpu.memory_space<vmem>>, vector<20x1xf32>
    %c2_18 = arith.constant 2 : index
    %c0_19 = arith.constant 0 : index
    %c0_20 = arith.constant 0 : index
    %32 = vector.load %arg2[%c2_18, %c0_19, %c0_20] : memref<6x20x20xf32, #tpu.memory_space<vmem>>, vector<1x20x20xf32>
    %33 = vector.shape_cast %32 : vector<1x20x20xf32> to vector<20x20xf32>
    %cst_21 = arith.constant dense<0.000000e+00> : vector<20x512xf32>
    %34 = tpu.matmul %33, %29, %cst_21 {dimension_numbers = #tpu.dot_dimension_numbers<[1], [0], [0], [1], [0, 0, 1, 1], [], []>} : vector<20x20xf32>, vector<20x512xf32>, vector<20x512xf32> -> vector<20x512xf32>
    %35 = vector.broadcast %30 : vector<20x1xf32> to vector<20x512xf32>
    %36 = arith.addf %34, %35 : vector<20x512xf32>
    %37 = math.tanh %36 : vector<20x512xf32>
    %c3 = arith.constant 3 : index
    %c0_22 = arith.constant 0 : index
    %c0_23 = arith.constant 0 : index
    %38 = vector.load %arg2[%c3, %c0_22, %c0_23] : memref<6x20x20xf32, #tpu.memory_space<vmem>>, vector<1x20x20xf32>
    %39 = vector.shape_cast %38 : vector<1x20x20xf32> to vector<20x20xf32>
    %cst_24 = arith.constant dense<0.000000e+00> : vector<20x512xf32>
    %40 = tpu.matmul %39, %37, %cst_24 {dimension_numbers = #tpu.dot_dimension_numbers<[1], [0], [0], [1], [0, 0, 1, 1], [], []>} : vector<20x20xf32>, vector<20x512xf32>, vector<20x512xf32> -> vector<20x512xf32>
    %41 = vector.broadcast %31 : vector<20x1xf32> to vector<20x512xf32>
    %42 = arith.addf %40, %41 : vector<20x512xf32>
    %43 = math.tanh %42 : vector<20x512xf32>
    %44 = arith.addf %43, %29 : vector<20x512xf32>
    %c0_25 = arith.constant 0 : index
    %c7 = arith.constant 7 : index
    %45 = vector.load %arg3[%c0_25, %c7] : memref<20x11xf32, #tpu.memory_space<vmem>>, vector<20x1xf32>
    %c0_26 = arith.constant 0 : index
    %c10 = arith.constant 10 : index
    %46 = vector.load %arg3[%c0_26, %c10] : memref<20x11xf32, #tpu.memory_space<vmem>>, vector<20x1xf32>
    %c4 = arith.constant 4 : index
    %c0_27 = arith.constant 0 : index
    %c0_28 = arith.constant 0 : index
    %47 = vector.load %arg2[%c4, %c0_27, %c0_28] : memref<6x20x20xf32, #tpu.memory_space<vmem>>, vector<1x20x20xf32>
    %48 = vector.shape_cast %47 : vector<1x20x20xf32> to vector<20x20xf32>
    %cst_29 = arith.constant dense<0.000000e+00> : vector<20x512xf32>
    %49 = tpu.matmul %48, %44, %cst_29 {dimension_numbers = #tpu.dot_dimension_numbers<[1], [0], [0], [1], [0, 0, 1, 1], [], []>} : vector<20x20xf32>, vector<20x512xf32>, vector<20x512xf32> -> vector<20x512xf32>
    %50 = vector.broadcast %45 : vector<20x1xf32> to vector<20x512xf32>
    %51 = arith.addf %49, %50 : vector<20x512xf32>
    %52 = math.tanh %51 : vector<20x512xf32>
    %c5_30 = arith.constant 5 : index
    %c0_31 = arith.constant 0 : index
    %c0_32 = arith.constant 0 : index
    %53 = vector.load %arg2[%c5_30, %c0_31, %c0_32] : memref<6x20x20xf32, #tpu.memory_space<vmem>>, vector<1x20x20xf32>
    %54 = vector.shape_cast %53 : vector<1x20x20xf32> to vector<20x20xf32>
    %cst_33 = arith.constant dense<0.000000e+00> : vector<20x512xf32>
    %55 = tpu.matmul %54, %52, %cst_33 {dimension_numbers = #tpu.dot_dimension_numbers<[1], [0], [0], [1], [0, 0, 1, 1], [], []>} : vector<20x20xf32>, vector<20x512xf32>, vector<20x512xf32> -> vector<20x512xf32>
    %56 = vector.broadcast %46 : vector<20x1xf32> to vector<20x512xf32>
    %57 = arith.addf %55, %56 : vector<20x512xf32>
    %58 = math.tanh %57 : vector<20x512xf32>
    %59 = arith.addf %58, %44 : vector<20x512xf32>
    %c0_34 = arith.constant 0 : index
    %c3_35 = arith.constant 3 : index
    %60 = vector.load %arg3[%c0_34, %c3_35] : memref<20x11xf32, #tpu.memory_space<vmem>>, vector<20x1xf32>
    %c0_36 = arith.constant 0 : index
    %c4_37 = arith.constant 4 : index
    %61 = vector.load %arg3[%c0_36, %c4_37] : memref<20x11xf32, #tpu.memory_space<vmem>>, vector<1x1xf32>
    %62 = vector.broadcast %60 : vector<20x1xf32> to vector<20x512xf32>
    %63 = arith.mulf %62, %59 : vector<20x512xf32>
    %cst_38 = arith.constant dense<0.000000e+00> : vector<512xf32>
    %64 = vector.multi_reduction <add>, %63, %cst_38 [0] : vector<20x512xf32> to vector<512xf32>
    %65 = vector.shape_cast %64 : vector<512xf32> to vector<1x512xf32>
    %66 = vector.broadcast %61 : vector<1x1xf32> to vector<1x512xf32>
    %67 = arith.addf %65, %66 : vector<1x512xf32>
    %c0_39 = arith.constant 0 : index
    %c0_40 = arith.constant 0 : index
    %68 = vector.load %arg4[%c0_39, %c0_40] : memref<1x512xf32, #tpu.memory_space<vmem>>, vector<1x512xf32>
    tpu.vector_store %arg4[%c0_39, %c0_40], %67 {strides = array<i32>} : memref<1x512xf32, #tpu.memory_space<vmem>>, vector<1x512xf32>,
    return
  }
  func.func @transform_0(%arg0: i32) -> (i32, i32) {
    %c0_i32 = arith.constant 0 : i32
    %c0_i32_0 = arith.constant 0 : i32
    return %c0_i32, %arg0 : i32, i32
  }
  func.func @transform_1(%arg0: i32) -> (i32, i32, i32) {
    %c0_i32 = arith.constant 0 : i32
    %c0_i32_0 = arith.constant 0 : i32
    %c0_i32_1 = arith.constant 0 : i32
    %c0_i32_2 = arith.constant 0 : i32
    return %c0_i32, %c0_i32_0, %c0_i32_1 : i32, i32, i32
  }
  func.func @transform_2(%arg0: i32) -> (i32, i32) {
    %c0_i32 = arith.constant 0 : i32
    %c0_i32_0 = arith.constant 0 : i32
    %c0_i32_1 = arith.constant 0 : i32
    return %c0_i32, %c0_i32_0 : i32, i32
  }
  func.func @transform_3(%arg0: i32) -> (i32, i32) {
    %c0_i32 = arith.constant 0 : i32
    %c0_i32_0 = arith.constant 0 : i32
    return %c0_i32, %arg0 : i32, i32
  }
}

</mosaic_0001>

<bundles_post_ra>
// kernel: burgers_dnn_forward.1
= control target key start
LH: loop header
LB: loop body
LE: loop exit
PB: predicated region body
PF: predicated region fallthrough
CT: control target
= control target key end

     0   :  { %s2142_s12 = smov 0   ;;  %s2523_s0 = inlined_call_operand.vmem [shape: f32[2,1024], index: 0, kind: input, shape index: {}]   ;;  %s2524_s1 = inlined_call_operand.vmem [shape: f32[6,20,20], index: 1, kind: input, shape index: {}]   ;;  %s2525_s2 = inlined_call_operand.vmem [shape: f32[20,11], index: 2, kind: input, shape index: {}]   ;;  %s2526_s3 = inlined_call_operand.vmem [shape: f32[1,1024], index: 3, kind: output, shape index: {}]  }
   0x1 LB: > { %s1800_s13 = sadd.s32 4294967295, %s2107_s12   ;;  %p1804_p0 = scmp.ge.s32.totalorder %s2107_s12, 1  ;;  %s2107_s12 = sphi %s2142_s12, %s13_s12  }
   0x2   : > { %p138_p1 = scmp.lt.s32.totalorder %s2107_s12, 3 }
   0x4   : > { %p139_p2 = pnand %p1804_p0, %p138_p1 }
   0x5   : > { %s1805_s20 = sshll.u32 (!%p139_p2), %s1800_s13, 2 }
   0x6   : > { %142 = sbr.rel (%p139_p2) target bundleno = 1558 (0x616), region = 32  ;;  %p162_p3 = scmp.lt.s32.totalorder (!%p139_p2), %s1805_s20, 7 }
   0xb   : > { %v2153_v0 = vld [vmem:[%s2525_s2 + $0x10] sm:$0xf]  ;;  %v2158_v1 = vld [vmem:[%s2525_s2 + $0x8] sm:$0xff]  ;;  %v2109_v2 = vmov 0   ;;  %v2110_v3 = vmov 1   ;;  %v2167_v4 = vld [vmem:[%s2525_s2] sm:$0xff]  ;;  %v194_v8 = vlaneseq }
   0xc   : > { %1909 = vset.pattern.permute.xlu1 %v2109_v2  ;;  %1907 = vset.pattern.permute.xlu0 %v2109_v2  ;;  %v2111_v5 = vmov 2   ;;  %v2112_v6 = vmov 0.0   ;;  %v2113_v7 = vmov 5   ;;  %s2528_s20 = smov (!%p162_p3, %s1805_s20), 7  ;;  %vm344_vm0 = vcmask 1043456  }
   0xd   : > { %190 = vperm.xlu0 %1907, %v2153_v0   ;;  %185 = vperm.xlu1 %1909, %v2158_v1   ;;  %s1806_s21 = sshll.u32 %s2528_s20, 1  ;;  %v2185_v9 = vshrl.u32 %v194_v8, 7  ;;  %vm334_vm1 = vcmask 162816   ;;  %vm1747_vm2 = vcmp.lt.s32.totalorder %v194_v8, 512 }
   0xe   : > { %421 = vmatprep.mubr.f32.mxu0 %v2112_v6  ;;  %504 = vmatprep.mubr.f32.mxu1 %v2112_v6  ;;  %s165_s24 = scalar_lea.vmem %s2523_s0, %s1806_s21  ;;  %s170_s21 = scalar_lea.vmem %s2526_s3, %s2528_s20 }
   0xf   : > { %v196_v12 = vsub.s32 0, %v2185_v9  ;;  %v1808_v13 = vld [vmem:[%s165_s24 + $0x1] ss:$2 sm:$0xf]  ;;  %v200_v14 = vsub.s32 1, %v2185_v9  ;;  %v204_v15 = vsub.s32 2, %v2185_v9 }
  0x10   : > { %v208_v16 = vsub.s32 3, %v2185_v9  ;;  %v172_v17 = vld [vmem:[%s165_s24] ss:$2 sm:$0xf] }
  0x11   : > { %1908 = vset.pattern.permute.xlu0 %v2110_v3  ;;  %1910 = vset.pattern.permute.xlu1 %v2110_v3  ;;  %v242_v19 = vrot.slane %v1808_v13, %v196_v12  ;;  %v246_v20 = vrot.slane %v1808_v13, %v200_v14  ;;  %v250_v21 = vrot.slane %v1808_v13, %v204_v15 }
  0x12   : > { %235 = vperm.xlu0 %1908, %v2153_v0   ;;  %231 = vperm.xlu1 %1910, %v2158_v1   ;;  %v197_v23 = vrot.slane %v172_v17, %v196_v12  ;;  %v254_v24 = vrot.slane %v1808_v13, %v208_v16  ;;  %v201_v25 = vrot.slane %v172_v17, %v200_v14 }
  0x13   : > { %v205_v26 = vrot.slane %v172_v17, %v204_v15  ;;  %v209_v27 = vrot.slane %v172_v17, %v208_v16 }
  0x16   : > { %1911 = vset.pattern.permute.xlu1 %v2109_v2  ;;  %227 = vperm.xlu0 %1908, %v2167_v4  }
  0x17   : > { %180 = vperm.xlu1 %1911, %v2167_v4  }
  0x1a   : > { %1913 = vset.pattern.permute.xlu0 %v2111_v5 }
  0x1b   : > { %288 = vperm.xlu0 %1913, %v2158_v1   ;;  %1912 = vset.pattern.permute.xlu1 %v2111_v5 }
  0x1c   : > { %292 = vperm.xlu1 %1912, %v2153_v0  }
  0x1f   : > { %1915 = vset.pattern.permute.xlu0 %v2113_v7 }
  0x20   : > { %284 = vperm.xlu1 %1912, %v2167_v4   ;;  %327 = vperm.xlu0 %1915, %v2158_v1  }
  0x24   : > { %1914 = vset.pattern.permute.xlu1 %v2113_v7 }
  0x25   : > { %331 = vperm.xlu1 %1914, %v2153_v0  }
  0x29   : > { %323 = vperm.xlu1 %1914, %v2167_v4  }
  0x88   : > { %v186_v10 = vpop.permute.xlu1 %185  ;;  %v191_v11 = vpop.permute.xlu0 %190 }
  0x89   : > { %v218_v33 = vmul.f32 %v197_v23, %v186_v10  ;;  %v219_v38 = vmul.f32 %v201_v25, %v186_v10  ;;  %v220_v39 = vmul.f32 %v205_v26, %v186_v10  ;;  %v221_v40 = vmul.f32 %v209_v27, %v186_v10 }
  0x8a   : > { %v222_v41 = vmul.f32 %v197_v23, %v191_v11  ;;  %v223_v42 = vmul.f32 %v201_v25, %v191_v11  ;;  %v224_v43 = vmul.f32 %v205_v26, %v191_v11  ;;  %v225_v44 = vmul.f32 %v209_v27, %v191_v11 }
  0x8d   : > { %v236_v18 = vpop.permute.xlu0 %235  ;;  %v232_v22 = vpop.permute.xlu1 %231 }
  0x8e   : > { %v267_v28 = vmul.f32 %v242_v19, %v236_v18  ;;  %v263_v29 = vmul.f32 %v242_v19, %v232_v22  ;;  %v264_v30 = vmul.f32 %v246_v20, %v232_v22  ;;  %v265_v31 = vmul.f32 %v250_v21, %v232_v22 }
  0x8f   : > { %v268_v34 = vmul.f32 %v246_v20, %v236_v18  ;;  %v269_v35 = vmul.f32 %v250_v21, %v236_v18  ;;  %v266_v36 = vmul.f32 %v254_v24, %v232_v22  ;;  %v270_v45 = vmul.f32 %v254_v24, %v236_v18 }
  0x90   : > { %v275_v46 = vadd.f32 %v263_v29, %v218_v33  ;;  %v276_v47 = vadd.f32 %v264_v30, %v219_v38  ;;  %v277_v48 = vadd.f32 %v265_v31, %v220_v39  ;;  %v279_v49 = vadd.f32 %v267_v28, %v222_v41  ;;  %v319_v33 = vld [vmem:[%s2524_s1] sm:$0xff] }
  0x91   : > { %v228_v32 = vpop.permute.xlu0 %227  ;;  %v278_v52 = vadd.f32 %v266_v36, %v221_v40  ;;  %v280_v53 = vadd.f32 %v268_v34, %v223_v42  ;;  %v281_v54 = vadd.f32 %v269_v35, %v224_v43  ;;  %v282_v63 = vadd.f32 %v270_v45, %v225_v44  ;;  %v320_v36 = vld [vmem:[%s2524_s1 + $0x8] sm:$0xff] }
  0x92   : > { %v181_v37 = vpop.permute.xlu1 %180  ;;  %v259_v50 = vmul.f32 %v242_v19, %v228_v32  ;;  %v260_v60 = vmul.f32 %v246_v20, %v228_v32  ;;  %v261_v2 = vmul.f32 %v250_v21, %v228_v32  ;;  %v262_v7 = vmul.f32 %v254_v24, %v228_v32 }
  0x93   : > { %v214_v55 = vmul.f32 %v197_v23, %v181_v37  ;;  %v215_v61 = vmul.f32 %v201_v25, %v181_v37  ;;  %v216_v3 = vmul.f32 %v205_v26, %v181_v37  ;;  %v217_v10 = vmul.f32 %v209_v27, %v181_v37  ;;  %v321_v37 = vld [vmem:[%s2524_s1 + $0x10] sm:$0xf] }
  0x94   : > { %v2114_v38 = vmov 8  }
  0x95   : > { %v271_v14 = vadd.f32 %v259_v50, %v214_v55  ;;  %v272_v16 = vadd.f32 %v260_v60, %v215_v61  ;;  %v273_v17 = vadd.f32 %v261_v2, %v216_v3  ;;  %v274_v19 = vadd.f32 %v262_v7, %v217_v10  ;;  %1916 = vset.pattern.permute.xlu1 %v2114_v38 }
  0x96   : > { %v289_v51 = vpop.permute.xlu0 %288  ;;  %1917 = vset.pattern.permute.xlu0 %v2114_v38  ;;  %548 = vperm.xlu1 %1916, %v2153_v0  }
  0x97   : > { %v299_v56 = vadd.f32 %v289_v51, %v275_v46  ;;  %v300_v57 = vadd.f32 %v289_v51, %v276_v47  ;;  %v301_v58 = vadd.f32 %v289_v51, %v277_v48  ;;  %v293_v59 = vpop.permute.xlu1 %292  ;;  %v302_v62 = vadd.f32 %v289_v51, %v278_v52  ;;  %544 = vperm.xlu0 %1917, %v2158_v1  }
  0x98   : > { %v303_v5 = vadd.f32 %v293_v59, %v279_v49  ;;  %v304_v11 = vadd.f32 %v293_v59, %v280_v53  ;;  %v305_v12 = vadd.f32 %v293_v59, %v281_v54  ;;  %v306_v15 = vadd.f32 %v293_v59, %v282_v63 }
  0x99   : > { %1930 = vtanh.f32 %v299_v56 }
  0x9a   : > { %1932 = vtanh.f32 %v300_v57  ;;  %540 = vperm.xlu1 %1916, %v2167_v4  }
  0x9b   : > { %1934 = vtanh.f32 %v301_v58  ;;  %v285_v13 = vpop.permute.xlu1 %284  ;;  %v328_v44 = vpop.permute.xlu0 %327 }
  0x9c   : > { %1936 = vtanh.f32 %v302_v62  ;;  %v295_v18 = vadd.f32 %v285_v13, %v271_v14  ;;  %v296_v20 = vadd.f32 %v285_v13, %v272_v16  ;;  %v297_v21 = vadd.f32 %v285_v13, %v273_v17 }
  0x9d   : > { %1938 = vtanh.f32 %v303_v5  ;;  %v298_v22 = vadd.f32 %v285_v13, %v274_v19 }
  0x9e   : > { %1940 = vtanh.f32 %v304_v11 }
  0x9f   : > { %1942 = vtanh.f32 %v305_v12 }
  0xa0   : > { %1944 = vtanh.f32 %v306_v15  ;;  %v332_v39 = vpop.permute.xlu1 %331 }
  0xa1   : > { %1946 = vtanh.f32 %v295_v18  ;;  %v1819_v18 = vld [vmem:[%s2524_s1 + $0x18] sm:$0xff] }
  0xa2   : > { %1948 = vtanh.f32 %v296_v20 }
  0xa3   : > { %1950 = vtanh.f32 %v297_v21  ;;  %v1820_v21 = vld [vmem:[%s2524_s1 + $0x20] sm:$0xff] }
  0xa4   : > { %1952 = vtanh.f32 %v298_v22  ;;  %v324_v41 = vpop.permute.xlu1 %323  ;;  %v1821_v22 = vld [vmem:[%s2524_s1 + $0x28] sm:$0xf] }
  0xa6   : > { %v2194_v23 = vpop.eup %1930 }
  0xa7   : > { %v2196_v24 = vpop.eup %1932 }
  0xa8   : > { %v2198_v25 = vpop.eup %1934 }
  0xa9   : > { %v2200_v26 = vpop.eup %1936 }
  0xaa   : > { %v2202_v27 = vpop.eup %1938 }
  0xab   : > { %v2204_v28 = vpop.eup %1940 }
  0xac   : > { %v2206_v29 = vpop.eup %1942  ;;  %1809 = vmatprep.subr.msk.mxu0 %vm344_vm0, %v2204_v28 }
  0xad   : > { %v2210_v30 = vpop.eup %1944  ;;  %1810 = vmatpush1.msk.msra.mxu0 %vm344_vm0, %v2202_v27 }
  0xae   : > { %v2214_v31 = vpop.eup %1946  ;;  %1814 = vmatprep.subr.msk.mxu1 %vm344_vm0, %v2210_v30  ;;  %385 = vmatprep.subr.mxu0 %v2196_v24 }
  0xaf   : > { %v2219_v32 = vpop.eup %1948  ;;  %1815 = vmatpush1.msk.msra.mxu1 %vm344_vm0, %v2206_v29  ;;  %386 = vmatpush1.msra.mxu0 %v2194_v23 }
  0xb0   : > { %v2227_v34 = vpop.eup %1950  ;;  %468 = vmatprep.subr.mxu1 %v2200_v26  ;;  %387 = vmatprep.subr.mxu0 %v2219_v32 }
  0xb1   : > { %v2231_v35 = vpop.eup %1952  ;;  %469 = vmatpush1.msra.mxu1 %v2198_v25  ;;  %388 = vmatpush1.msra.mxu0 %v2214_v31 }
  0xb2   : > { %470 = vmatprep.subr.mxu1 %v2231_v35  ;;  %1811 = vmatmul.mubr.msk.f32.vlgmr.msra.gmra.mxu0 %vm334_vm1, %v319_v33 }
  0xb3   : > { %471 = vmatpush1.msra.mxu1 %v2227_v34  ;;  %427 = vmatprep.mubr.f32.mxu0 %v2112_v6 }
  0xb4   : > { %1816 = vmatmul.mubr.msk.f32.vlgmr.msra.gmra.mxu1 %vm334_vm1, %v319_v33  ;;  %v2115_v33 = vmov 6  }
  0xb5   : > { %510 = vmatprep.mubr.f32.mxu1 %v2112_v6  ;;  %1918 = vset.pattern.permute.xlu1 %v2115_v33 }
  0xb6   : > { %1812 = vmatmul.mubr.msk.f32.gmra.mxu0 %vm334_vm1, %v320_v36  ;;  %1919 = vset.pattern.permute.xlu0 %v2115_v33 }
  0xb7   : > { %433 = vmatprep.mubr.f32.mxu0 %v2112_v6  ;;  %775 = vperm.xlu1 %1918, %v2153_v0  }
  0xb8   : > { %1817 = vmatmul.mubr.msk.f32.gmra.mxu1 %vm334_vm1, %v320_v36  ;;  %771 = vperm.xlu0 %1919, %v2158_v1  }
  0xb9   : > { %516 = vmatprep.mubr.f32.mxu1 %v2112_v6 }
  0xba   : > { %1813 = vmatmul.mubr.msk.f32.gmra.mxu0 %vm334_vm1, %v321_v37 }
  0xbb   : > { %636 = vmatprep.mubr.f32.mxu0 %v2112_v6  ;;  %767 = vperm.xlu1 %1918, %v2167_v4  }
  0xbc   : > { %1818 = vmatmul.mubr.msk.f32.gmra.mxu1 %vm334_vm1, %v321_v37 }
  0xbd   : > { %719 = vmatprep.mubr.f32.mxu1 %v2112_v6 }
 0x111   : > { %v549_v36 = vpop.permute.xlu1 %548 }
 0x115   : > { %v541_v37 = vpop.permute.xlu1 %540 }
 0x172   : > { %v423_v40 = vpop.f32.mrf.mxu0 }
 0x173   : > { %v424_v47 = vadd.f32 %v423_v40, %v324_v41 }
 0x174   : > { %v506_v42 = vpop.f32.mrf.mxu1  ;;  %v425_v43 = vpop.f32.mrf.mxu0 }
 0x175   : > { %v426_v48 = vadd.f32 %v425_v43, %v324_v41  ;;  %1954 = vtanh.f32 %v424_v47  ;;  %v507_v3 = vadd.f32 %v506_v42, %v324_v41  ;;  %v545_v42 = vpop.permute.xlu0 %544 }
 0x176   : > { %v508_v45 = vpop.f32.mrf.mxu1  ;;  %v429_v46 = vpop.f32.mrf.mxu0 }
 0x177   : > { %v430_v51 = vadd.f32 %v429_v46, %v328_v44  ;;  %1956 = vtanh.f32 %v426_v48  ;;  %v509_v2 = vadd.f32 %v508_v45, %v324_v41 }
 0x178   : > { %v512_v49 = vpop.f32.mrf.mxu1  ;;  %v431_v50 = vpop.f32.mrf.mxu0 }
 0x179   : > { %v432_v52 = vadd.f32 %v431_v50, %v328_v44  ;;  %1958 = vtanh.f32 %v430_v51  ;;  %v513_v63 = vadd.f32 %v512_v49, %v328_v44 }
 0x17a   : > { %v514_v53 = vpop.f32.mrf.mxu1  ;;  %v435_v54 = vpop.f32.mrf.mxu0 }
 0x17b   : > { %v436_v55 = vadd.f32 %v435_v54, %v332_v39  ;;  %1960 = vtanh.f32 %v432_v52  ;;  %v515_v61 = vadd.f32 %v514_v53, %v328_v44 }
 0x17c   : > { %v518_v56 = vpop.f32.mrf.mxu1  ;;  %v437_v57 = vpop.f32.mrf.mxu0 }
 0x17d   : > { %v438_v58 = vadd.f32 %v437_v57, %v332_v39  ;;  %v519_v59 = vadd.f32 %v518_v56, %v332_v39  ;;  %1962 = vtanh.f32 %v436_v55 }
 0x17e   : > { %v520_v60 = vpop.f32.mrf.mxu1 }
 0x17f   : > { %v521_v62 = vadd.f32 %v520_v60, %v332_v39  ;;  %1964 = vtanh.f32 %v438_v58 }
 0x181   : > { %1966 = vtanh.f32 %v521_v62 }
 0x182   : > { %1968 = vtanh.f32 %v519_v59  ;;  %v1955_v5 = vpop.eup %1954 }
 0x183   : > { %1970 = vtanh.f32 %v515_v61 }
 0x184   : > { %1972 = vtanh.f32 %v513_v63  ;;  %v1957_v7 = vpop.eup %1956 }
 0x185   : > { %1974 = vtanh.f32 %v509_v2 }
 0x186   : > { %1976 = vtanh.f32 %v507_v3  ;;  %v1959_v10 = vpop.eup %1958 }
 0x188   : > { %v1961_v11 = vpop.eup %1960 }
 0x18a   : > { %v1963_v12 = vpop.eup %1962 }
 0x18c   : > { %v1965_v13 = vpop.eup %1964 }
 0x18d   : > { %1822 = vmatprep.subr.msk.mxu0 %vm344_vm0, %v1965_v13 }
 0x18e   : > { %v1967_v14 = vpop.eup %1966  ;;  %1823 = vmatpush1.msk.msra.mxu0 %vm344_vm0, %v1963_v12 }
 0x18f   : > { %v1969_v15 = vpop.eup %1968  ;;  %1827 = vmatprep.subr.msk.mxu1 %vm344_vm0, %v1967_v14  ;;  %600 = vmatprep.subr.mxu0 %v1961_v11 }
 0x190   : > { %v1971_v16 = vpop.eup %1970  ;;  %1828 = vmatpush1.msk.msra.mxu1 %vm344_vm0, %v1969_v15  ;;  %601 = vmatpush1.msra.mxu0 %v1959_v10 }
 0x191   : > { %v1973_v17 = vpop.eup %1972  ;;  %683 = vmatprep.subr.mxu1 %v1971_v16  ;;  %602 = vmatprep.subr.mxu0 %v1957_v7 }
 0x192   : > { %v1975_v19 = vpop.eup %1974  ;;  %684 = vmatpush1.msra.mxu1 %v1973_v17  ;;  %603 = vmatpush1.msra.mxu0 %v1955_v5 }
 0x193   : > { %v1977_v20 = vpop.eup %1976  ;;  %685 = vmatprep.subr.mxu1 %v1975_v19  ;;  %1824 = vmatmul.mubr.msk.f32.vlgmr.msra.gmra.mxu0 %vm334_vm1, %v1819_v18 }
 0x194   : > { %686 = vmatpush1.msra.mxu1 %v1977_v20  ;;  %642 = vmatprep.mubr.f32.mxu0 %v2112_v6 }
 0x195   : > { %1829 = vmatmul.mubr.msk.f32.vlgmr.msra.gmra.mxu1 %vm334_vm1, %v1819_v18 }
 0x196   : > { %725 = vmatprep.mubr.f32.mxu1 %v2112_v6 }
 0x197   : > { %1825 = vmatmul.mubr.msk.f32.gmra.mxu0 %vm334_vm1, %v1820_v21 }
 0x198   : > { %648 = vmatprep.mubr.f32.mxu0 %v2112_v6 }
 0x199   : > { %1830 = vmatmul.mubr.msk.f32.gmra.mxu1 %vm334_vm1, %v1820_v21 }
 0x19a   : > { %731 = vmatprep.mubr.f32.mxu1 %v2112_v6 }
 0x19b   : > { %1826 = vmatmul.mubr.msk.f32.gmra.mxu0 %vm334_vm1, %v1821_v22 }
 0x19c   : > { %863 = vmatprep.mubr.f32.mxu0 %v2112_v6 }
 0x19d   : > { %1831 = vmatmul.mubr.msk.f32.gmra.mxu1 %vm334_vm1, %v1821_v22 }
 0x19e   : > { %946 = vmatprep.mubr.f32.mxu1 %v2112_v6 }
 0x253   : > { %v638_v38 = vpop.f32.mrf.mxu0 }
 0x254   : > { %v639_v40 = vadd.f32 %v638_v38, %v541_v37 }
 0x255   : > { %v721_v39 = vpop.f32.mrf.mxu1  ;;  %v640_v41 = vpop.f32.mrf.mxu0 }
 0x256   : > { %v641_v43 = vadd.f32 %v640_v41, %v541_v37  ;;  %1978 = vtanh.f32 %v639_v40  ;;  %v722_v62 = vadd.f32 %v721_v39, %v541_v37  ;;  %v772_v39 = vpop.permute.xlu0 %771 }
 0x257   : > { %v723_v44 = vpop.f32.mrf.mxu1  ;;  %v644_v45 = vpop.f32.mrf.mxu0 }
 0x258   : > { %v645_v46 = vadd.f32 %v644_v45, %v545_v42  ;;  %1980 = vtanh.f32 %v641_v43  ;;  %v724_v60 = vadd.f32 %v723_v44, %v541_v37 }
 0x259   : > { %v727_v47 = vpop.f32.mrf.mxu1  ;;  %v646_v48 = vpop.f32.mrf.mxu0 }
 0x25a   : > { %v647_v49 = vadd.f32 %v646_v48, %v545_v42  ;;  %1982 = vtanh.f32 %v645_v46  ;;  %v728_v57 = vadd.f32 %v727_v47, %v545_v42 }
 0x25b   : > { %v729_v50 = vpop.f32.mrf.mxu1  ;;  %v650_v52 = vpop.f32.mrf.mxu0 }
 0x25c   : > { %v730_v51 = vadd.f32 %v729_v50, %v545_v42  ;;  %1984 = vtanh.f32 %v647_v49  ;;  %v651_v53 = vadd.f32 %v650_v52, %v549_v36 }
 0x25d   : > { %v733_v54 = vpop.f32.mrf.mxu1  ;;  %v652_v56 = vpop.f32.mrf.mxu0 }
 0x25e   : > { %1986 = vtanh.f32 %v730_v51  ;;  %v734_v55 = vadd.f32 %v733_v54, %v549_v36  ;;  %v653_v58 = vadd.f32 %v652_v56, %v549_v36 }
 0x25f   : > { %1988 = vtanh.f32 %v651_v53  ;;  %v735_v59 = vpop.f32.mrf.mxu1 }
 0x260   : > { %1990 = vtanh.f32 %v734_v55  ;;  %v736_v61 = vadd.f32 %v735_v59, %v549_v36 }
 0x261   : > { %1992 = vtanh.f32 %v653_v58 }
 0x262   : > { %1994 = vtanh.f32 %v736_v61 }
 0x263   : > { %1996 = vtanh.f32 %v728_v57  ;;  %v1979_v63 = vpop.eup %1978 }
 0x264   : > { %1998 = vtanh.f32 %v724_v60 }
 0x265   : > { %2000 = vtanh.f32 %v722_v62  ;;  %v1981_v2 = vpop.eup %1980 }
 0x267   : > { %v1983_v3 = vpop.eup %1982 }
 0x269   : > { %v1985_v5 = vpop.eup %1984 }
 0x26a   : > { %v2301_v20 = vadd.f32 %v1985_v5, %v2196_v24 }
 0x26b   : > { %v1987_v7 = vpop.eup %1986 }
 0x26c   : > { %v1989_v10 = vpop.eup %1988 }
 0x26d   : > { %v1991_v11 = vpop.eup %1990  ;;  %v2293_v17 = vadd.f32 %v1989_v10, %v2202_v27  ;;  %v2308_v27 = vadd.f32 %v1987_v7, %v2200_v26 }
 0x26e   : > { %v1993_v12 = vpop.eup %1992  ;;  %v2298_v19 = vadd.f32 %v1991_v11, %v2206_v29  ;;  %v2320_v29 = vadd.f32 %v1981_v2, %v2219_v32  ;;  %v1834_v32 = vld [vmem:[%s2524_s1 + $0x40] sm:$0xf] }
 0x26f   : > { %v1995_v13 = vpop.eup %1994  ;;  %v2287_v14 = vadd.f32 %v1993_v12, %v2204_v28  ;;  %v2311_v28 = vadd.f32 %v1983_v3, %v2194_v23  ;;  %v2328_v23 = vadd.f32 %v1979_v63, %v2214_v31  ;;  %v1833_v31 = vld [vmem:[%s2524_s1 + $0x38] sm:$0xff]  ;;  %v1845_v12 = vld [vmem:[%s2524_s1 + $0x48] sm:$0xff] }
 0x270   : > { %v1997_v15 = vpop.eup %1996  ;;  %v2290_v16 = vadd.f32 %v1995_v13, %v2210_v30  ;;  %v1832_v30 = vld [vmem:[%s2524_s1 + $0x30] sm:$0xff] }
 0x271   : > { %v1999_v18 = vpop.eup %1998  ;;  %1835 = vmatprep.subr.msk.mxu0 %vm344_vm0, %v2287_v14  ;;  %v2317_v24 = vadd.f32 %v1997_v15, %v2198_v25 }
 0x272   : > { %v2001_v21 = vpop.eup %2000  ;;  %1840 = vmatprep.subr.msk.mxu1 %vm344_vm0, %v2290_v16  ;;  %1836 = vmatpush1.msk.msra.mxu0 %vm344_vm0, %v2293_v17  ;;  %v2325_v26 = vadd.f32 %v1999_v18, %v2231_v35  ;;  %v776_v35 = vpop.permute.xlu1 %775  ;;  %v1846_v18 = vld [vmem:[%s2524_s1 + $0x50] sm:$0xff] }
 0x273   : > { %1841 = vmatpush1.msk.msra.mxu1 %vm344_vm0, %v2298_v19  ;;  %827 = vmatprep.subr.mxu0 %v2301_v20  ;;  %v2336_v25 = vadd.f32 %v2001_v21, %v2227_v34  ;;  %v2116_v34 = vmov 9   ;;  %v1847_v21 = vld [vmem:[%s2524_s1 + $0x58] sm:$0xf] }
 0x274   : > { %910 = vmatprep.subr.mxu1 %v2308_v27  ;;  %828 = vmatpush1.msra.mxu0 %v2311_v28 }
 0x275   : > { %911 = vmatpush1.msra.mxu1 %v2317_v24  ;;  %829 = vmatprep.subr.mxu0 %v2320_v29 }
 0x276   : > { %912 = vmatprep.subr.mxu1 %v2325_v26  ;;  %830 = vmatpush1.msra.mxu0 %v2328_v23  ;;  %v768_v33 = vpop.permute.xlu1 %767 }
 0x277   : > { %913 = vmatpush1.msra.mxu1 %v2336_v25  ;;  %1837 = vmatmul.mubr.msk.f32.vlgmr.msra.gmra.mxu0 %vm334_vm1, %v1832_v30 }
 0x278   : > { %1842 = vmatmul.mubr.msk.f32.vlgmr.msra.gmra.mxu1 %vm334_vm1, %v1832_v30  ;;  %869 = vmatprep.mubr.f32.mxu0 %v2112_v6  ;;  %v2117_v30 = vmov 7  }
 0x279   : > { %952 = vmatprep.mubr.f32.mxu1 %v2112_v6  ;;  %1920 = vset.pattern.permute.xlu1 %v2116_v34 }
 0x27a   : > { %1921 = vset.pattern.permute.xlu0 %v2116_v34  ;;  %990 = vperm.xlu1 %1920, %v2153_v0  }
 0x27b   : > { %1838 = vmatmul.mubr.msk.f32.gmra.mxu0 %vm334_vm1, %v1833_v31  ;;  %986 = vperm.xlu0 %1921, %v2158_v1  }
 0x27c   : > { %1843 = vmatmul.mubr.msk.f32.gmra.mxu1 %vm334_vm1, %v1833_v31  ;;  %875 = vmatprep.mubr.f32.mxu0 %v2112_v6 }
 0x27d   : > { %958 = vmatprep.mubr.f32.mxu1 %v2112_v6 }
 0x27e   : > { %982 = vperm.xlu1 %1920, %v2167_v4  }
 0x27f   : > { %1839 = vmatmul.mubr.msk.f32.gmra.mxu0 %vm334_vm1, %v1834_v32  ;;  %1923 = vset.pattern.permute.xlu0 %v2117_v30 }
 0x280   : > { %1844 = vmatmul.mubr.msk.f32.gmra.mxu1 %vm334_vm1, %v1834_v32  ;;  %1078 = vmatprep.mubr.f32.mxu0 %v2112_v6 }
 0x281   : > { %1161 = vmatprep.mubr.f32.mxu1 %v2112_v6  ;;  %1213 = vperm.xlu0 %1923, %v2158_v1  }
 0x282   : > { %1922 = vset.pattern.permute.xlu1 %v2117_v30  ;;  %v1646_v30 = vld [vmem:[%s2525_s2] sm:$0x1] }
 0x283   : > { %1217 = vperm.xlu1 %1922, %v2153_v0  }
 0x287   : > { %1209 = vperm.xlu1 %1922, %v2167_v4  }
 0x2f5   : > { %v991_v31 = vpop.permute.xlu1 %990 }
 0x2f9   : > { %v983_v32 = vpop.permute.xlu1 %982 }
 0x337   : > { %v865_v22 = vpop.f32.mrf.mxu0 }
 0x338   : > { %v948_v36 = vpop.f32.mrf.mxu1  ;;  %v866_v40 = vadd.f32 %v865_v22, %v768_v33 }
 0x339   : > { %v867_v37 = vpop.f32.mrf.mxu0  ;;  %v949_v59 = vadd.f32 %v948_v36, %v768_v33  ;;  %v987_v36 = vpop.permute.xlu0 %986 }
 0x33a   : > { %v950_v38 = vpop.f32.mrf.mxu1  ;;  %v868_v42 = vadd.f32 %v867_v37, %v768_v33  ;;  %2002 = vtanh.f32 %v866_v40 }
 0x33b   : > { %v871_v41 = vpop.f32.mrf.mxu0  ;;  %v951_v58 = vadd.f32 %v950_v38, %v768_v33 }
 0x33c   : > { %v954_v43 = vpop.f32.mrf.mxu1  ;;  %v872_v44 = vadd.f32 %v871_v41, %v772_v39  ;;  %2004 = vtanh.f32 %v868_v42 }
 0x33d   : > { %v873_v45 = vpop.f32.mrf.mxu0  ;;  %v955_v57 = vadd.f32 %v954_v43, %v772_v39 }
 0x33e   : > { %v874_v46 = vadd.f32 %v873_v45, %v772_v39  ;;  %v956_v47 = vpop.f32.mrf.mxu1  ;;  %2006 = vtanh.f32 %v872_v44 }
 0x33f   : > { %v877_v48 = vpop.f32.mrf.mxu0  ;;  %v957_v55 = vadd.f32 %v956_v47, %v772_v39 }
 0x340   : > { %v878_v49 = vadd.f32 %v877_v48, %v776_v35  ;;  %v960_v50 = vpop.f32.mrf.mxu1  ;;  %2008 = vtanh.f32 %v874_v46 }
 0x341   : > { %v879_v51 = vpop.f32.mrf.mxu0  ;;  %v961_v52 = vadd.f32 %v960_v50, %v776_v35 }
 0x342   : > { %v880_v53 = vadd.f32 %v879_v51, %v776_v35  ;;  %v962_v54 = vpop.f32.mrf.mxu1  ;;  %2010 = vtanh.f32 %v878_v49 }
 0x343   : > { %v963_v56 = vadd.f32 %v962_v54, %v776_v35 }
 0x344   : > { %2012 = vtanh.f32 %v880_v53 }
 0x345   : > { %2014 = vtanh.f32 %v963_v56 }
 0x346   : > { %2016 = vtanh.f32 %v961_v52 }
 0x347   : > { %2018 = vtanh.f32 %v957_v55  ;;  %v2003_v60 = vpop.eup %2002 }
 0x348   : > { %2020 = vtanh.f32 %v955_v57 }
 0x349   : > { %2022 = vtanh.f32 %v951_v58  ;;  %v2005_v61 = vpop.eup %2004 }
 0x34a   : > { %2024 = vtanh.f32 %v949_v59 }
 0x34b   : > { %v2007_v62 = vpop.eup %2006 }
 0x34d   : > { %v2009_v63 = vpop.eup %2008 }
 0x34f   : > { %v2011_v2 = vpop.eup %2010 }
 0x351   : > { %v2013_v3 = vpop.eup %2012 }
 0x352   : > { %v2015_v5 = vpop.eup %2014  ;;  %1848 = vmatprep.subr.msk.mxu0 %vm344_vm0, %v2013_v3 }
 0x353   : > { %v2017_v7 = vpop.eup %2016  ;;  %1853 = vmatprep.subr.msk.mxu1 %vm344_vm0, %v2015_v5  ;;  %1849 = vmatpush1.msk.msra.mxu0 %vm344_vm0, %v2011_v2 }
 0x354   : > { %v2019_v10 = vpop.eup %2018  ;;  %1854 = vmatpush1.msk.msra.mxu1 %vm344_vm0, %v2017_v7  ;;  %1042 = vmatprep.subr.mxu0 %v2009_v63 }
 0x355   : > { %v2021_v11 = vpop.eup %2020  ;;  %1125 = vmatprep.subr.mxu1 %v2019_v10  ;;  %1043 = vmatpush1.msra.mxu0 %v2007_v62 }
 0x356   : > { %v2023_v13 = vpop.eup %2022  ;;  %1126 = vmatpush1.msra.mxu1 %v2021_v11  ;;  %1044 = vmatprep.subr.mxu0 %v2005_v61 }
 0x357   : > { %v2025_v15 = vpop.eup %2024  ;;  %1127 = vmatprep.subr.mxu1 %v2023_v13  ;;  %1045 = vmatpush1.msra.mxu0 %v2003_v60  ;;  %v2099_v13 = vld [vmem:[%s2525_s2 + $0x8] sm:$0xff] }
 0x358   : > { %1128 = vmatpush1.msra.mxu1 %v2025_v15  ;;  %1850 = vmatmul.mubr.msk.f32.vlgmr.msra.gmra.mxu0 %vm334_vm1, %v1845_v12  ;;  %v2100_v15 = vld [vmem:[%s2525_s2 + $0x10] sm:$0xf] }
 0x359   : > { %1855 = vmatmul.mubr.msk.f32.vlgmr.msra.gmra.mxu1 %vm334_vm1, %v1845_v12  ;;  %1084 = vmatprep.mubr.f32.mxu0 %v2112_v6 }
 0x35a   : > { %1167 = vmatprep.mubr.f32.mxu1 %v2112_v6 }
 0x35c   : > { %1851 = vmatmul.mubr.msk.f32.gmra.mxu0 %vm334_vm1, %v1846_v18 }
 0x35d   : > { %1856 = vmatmul.mubr.msk.f32.gmra.mxu1 %vm334_vm1, %v1846_v18  ;;  %1090 = vmatprep.mubr.f32.mxu0 %v2112_v6  ;;  %v2119_v18 = vmov 3  }
 0x35e   : > { %1173 = vmatprep.mubr.f32.mxu1 %v2112_v6 }
 0x360   : > { %1852 = vmatmul.mubr.msk.f32.gmra.mxu0 %vm334_vm1, %v1847_v21 }
 0x361   : > { %1857 = vmatmul.mubr.msk.f32.gmra.mxu1 %vm334_vm1, %v1847_v21  ;;  %1305 = vmatprep.mubr.f32.mxu0 %v2112_v6  ;;  %v2120_v21 = vmov 4  }
 0x362   : > { %1388 = vmatprep.mubr.f32.mxu1 %v2112_v6 }
 0x418   : > { %v1080_v34 = vpop.f32.mrf.mxu0 }
 0x419   : > { %v1163_v35 = vpop.f32.mrf.mxu1  ;;  %v1081_v22 = vadd.f32 %v1080_v34, %v983_v32 }
 0x41a   : > { %v1082_v33 = vpop.f32.mrf.mxu0  ;;  %v1164_v53 = vadd.f32 %v1163_v35, %v983_v32 }
 0x41b   : > { %v1083_v37 = vadd.f32 %v1082_v33, %v983_v32  ;;  %v1165_v38 = vpop.f32.mrf.mxu1  ;;  %2026 = vtanh.f32 %v1081_v22 }
 0x41c   : > { %v1086_v39 = vpop.f32.mrf.mxu0  ;;  %v1166_v51 = vadd.f32 %v1165_v38, %v983_v32 }
 0x41d   : > { %v1087_v40 = vadd.f32 %v1086_v39, %v987_v36  ;;  %v1169_v41 = vpop.f32.mrf.mxu1  ;;  %2028 = vtanh.f32 %v1083_v37 }
 0x41e   : > { %v1088_v42 = vpop.f32.mrf.mxu0  ;;  %v1170_v48 = vadd.f32 %v1169_v41, %v987_v36 }
 0x41f   : > { %v1089_v0 = vadd.f32 %v1088_v42, %v987_v36  ;;  %v1171_v43 = vpop.f32.mrf.mxu1  ;;  %2030 = vtanh.f32 %v1087_v40 }
 0x420   : > { %v1172_v1 = vadd.f32 %v1171_v43, %v987_v36  ;;  %v1092_v4 = vpop.f32.mrf.mxu0  ;;  %v1214_v36 = vpop.permute.xlu0 %1213 }
 0x421   : > { %2032 = vtanh.f32 %v1089_v0  ;;  %v1093_v44 = vadd.f32 %v1092_v4, %v991_v31  ;;  %v1175_v45 = vpop.f32.mrf.mxu1 }
 0x422   : > { %2034 = vtanh.f32 %v1172_v1  ;;  %v1176_v46 = vadd.f32 %v1175_v45, %v991_v31  ;;  %v1094_v47 = vpop.f32.mrf.mxu0 }
 0x423   : > { %2036 = vtanh.f32 %v1093_v44  ;;  %v1095_v49 = vadd.f32 %v1094_v47, %v991_v31  ;;  %v1177_v50 = vpop.f32.mrf.mxu1 }
 0x424   : > { %2038 = vtanh.f32 %v1176_v46  ;;  %v1178_v52 = vadd.f32 %v1177_v50, %v991_v31  ;;  %v1218_v31 = vpop.permute.xlu1 %1217 }
 0x425   : > { %2040 = vtanh.f32 %v1095_v49 }
 0x426   : > { %2042 = vtanh.f32 %v1178_v52 }
 0x427   : > { %2044 = vtanh.f32 %v1170_v48 }
 0x428   : > { %2046 = vtanh.f32 %v1166_v51  ;;  %v2027_v54 = vpop.eup %2026  ;;  %v1210_v34 = vpop.permute.xlu1 %1209 }
 0x429   : > { %2048 = vtanh.f32 %v1164_v53 }
 0x42a   : > { %v2029_v55 = vpop.eup %2028 }
 0x42c   : > { %v2031_v56 = vpop.eup %2030 }
 0x42e   : > { %v2033_v57 = vpop.eup %2032 }
 0x42f   : > { %v2035_v58 = vpop.eup %2034  ;;  %v2405_v11 = vadd.f32 %v2033_v57, %v2301_v20 }
 0x430   : > { %v2037_v59 = vpop.eup %2036 }
 0x431   : > { %v2039_v60 = vpop.eup %2038  ;;  %v2397_v5 = vadd.f32 %v2037_v59, %v2293_v17 }
 0x432   : > { %v2041_v61 = vpop.eup %2040  ;;  %v2402_v10 = vadd.f32 %v2039_v60, %v2298_v19  ;;  %v2424_v19 = vadd.f32 %v2029_v55, %v2320_v29  ;;  %v1859_v29 = vld [vmem:[%s2524_s1 + $0x68] sm:$0xff] }
 0x433   : > { %v2043_v62 = vpop.eup %2042  ;;  %v2391_v63 = vadd.f32 %v2041_v61, %v2287_v14  ;;  %v2412_v14 = vadd.f32 %v2035_v58, %v2308_v27  ;;  %v2432_v27 = vadd.f32 %v2027_v54, %v2328_v23  ;;  %v2118_v23 = vmov 10  }
 0x434   : > { %v2045_v2 = vpop.eup %2044  ;;  %v2394_v3 = vadd.f32 %v2043_v62, %v2290_v16  ;;  %v2415_v16 = vadd.f32 %v2031_v56, %v2311_v28  ;;  %v1858_v28 = vld [vmem:[%s2524_s1 + $0x60] sm:$0xff]  ;;  %1924 = vset.pattern.permute.xlu1 %v2118_v23  ;;  %1925 = vset.pattern.permute.xlu0 %v2118_v23 }
 0x435   : > { %v2047_v7 = vpop.eup %2046  ;;  %1861 = vmatprep.subr.msk.mxu0 %vm344_vm0, %v2391_v63  ;;  %v2421_v17 = vadd.f32 %v2045_v2, %v2317_v24  ;;  %1428 = vperm.xlu0 %1925, %v2099_v13  }
 0x436   : > { %v2049_v12 = vpop.eup %2048  ;;  %1866 = vmatprep.subr.msk.mxu1 %vm344_vm0, %v2394_v3  ;;  %1862 = vmatpush1.msk.msra.mxu0 %vm344_vm0, %v2397_v5  ;;  %v2429_v20 = vadd.f32 %v2047_v7, %v2325_v26  ;;  %v1860_v26 = vld [vmem:[%s2524_s1 + $0x70] sm:$0xf]  ;;  %v1871_v7 = vld [vmem:[%s2524_s1 + $0x78] sm:$0xff] }
 0x437   : > { %1867 = vmatpush1.msk.msra.mxu1 %vm344_vm0, %v2402_v10  ;;  %1269 = vmatprep.subr.mxu0 %v2405_v11  ;;  %v2440_v24 = vadd.f32 %v2049_v12, %v2336_v25  ;;  %v2098_v25 = vld [vmem:[%s2525_s2] sm:$0xff] }
 0x438   : > { %1352 = vmatprep.subr.mxu1 %v2412_v14  ;;  %1270 = vmatpush1.msra.mxu0 %v2415_v16 }
 0x439   : > { %1353 = vmatpush1.msra.mxu1 %v2421_v17  ;;  %1271 = vmatprep.subr.mxu0 %v2424_v19 }
 0x43a   : > { %1354 = vmatprep.subr.mxu1 %v2429_v20  ;;  %1272 = vmatpush1.msra.mxu0 %v2432_v27 }
 0x43b   : > { %1355 = vmatpush1.msra.mxu1 %v2440_v24  ;;  %1863 = vmatmul.mubr.msk.f32.vlgmr.msra.gmra.mxu0 %vm334_vm1, %v1858_v28 }
 0x43c   : > { %1868 = vmatmul.mubr.msk.f32.vlgmr.msra.gmra.mxu1 %vm334_vm1, %v1858_v28  ;;  %1311 = vmatprep.mubr.f32.mxu0 %v2112_v6 }
 0x43d   : > { %1394 = vmatprep.mubr.f32.mxu1 %v2112_v6  ;;  %1424 = vperm.xlu1 %1924, %v2098_v25  }
 0x43e   : > { %1927 = vset.pattern.permute.xlu0 %v2119_v18 }
 0x43f   : > { %1864 = vmatmul.mubr.msk.f32.gmra.mxu0 %vm334_vm1, %v1859_v29  ;;  %1652 = vperm.xlu0 %1927, %v2099_v13  }
 0x440   : > { %1869 = vmatmul.mubr.msk.f32.gmra.mxu1 %vm334_vm1, %v1859_v29  ;;  %1317 = vmatprep.mubr.f32.mxu0 %v2112_v6  ;;  %v1872_v29 = vld [vmem:[%s2524_s1 + $0x80] sm:$0xff] }
 0x441   : > { %1400 = vmatprep.mubr.f32.mxu1 %v2112_v6  ;;  %1432 = vperm.xlu1 %1924, %v2100_v15  }
 0x443   : > { %1865 = vmatmul.mubr.msk.f32.gmra.mxu0 %vm334_vm1, %v1860_v26  ;;  %1929 = vset.pattern.permute.xlu0 %v2120_v21 }
 0x444   : > { %1870 = vmatmul.mubr.msk.f32.gmra.mxu1 %vm334_vm1, %v1860_v26  ;;  %1520 = vmatprep.mubr.f32.mxu0 %v2112_v6  ;;  %v1873_v26 = vld [vmem:[%s2524_s1 + $0x88] sm:$0xf] }
 0x445   : > { %1603 = vmatprep.mubr.f32.mxu1 %v2112_v6  ;;  %1926 = vset.pattern.permute.xlu1 %v2119_v18 }
 0x446   : > { %1648 = vperm.xlu1 %1926, %v2098_v25  }
 0x44a   : > { %1656 = vperm.xlu1 %1926, %v2100_v15  }
 0x44e   : > { %1928 = vset.pattern.permute.xlu1 %v2120_v21 }
 0x44f   : > { %1709 = vperm.xlu1 %1928, %v1646_v30  }
 0x4b0   : > { %v1429_v30 = vpop.permute.xlu0 %1428 }
 0x4b8   : > { %v1425_v23 = vpop.permute.xlu1 %1424 }
 0x4fb   : > { %v1307_v32 = vpop.f32.mrf.mxu0 }
 0x4fc   : > { %v1390_v35 = vpop.f32.mrf.mxu1  ;;  %v1308_v37 = vadd.f32 %v1307_v32, %v1210_v34 }
 0x4fd   : > { %v1309_v22 = vpop.f32.mrf.mxu0  ;;  %v1391_v53 = vadd.f32 %v1390_v35, %v1210_v34 }
 0x4fe   : > { %v1392_v33 = vpop.f32.mrf.mxu1  ;;  %v1310_v39 = vadd.f32 %v1309_v22, %v1210_v34  ;;  %2050 = vtanh.f32 %v1308_v37 }
 0x4ff   : > { %v1313_v38 = vpop.f32.mrf.mxu0  ;;  %v1393_v52 = vadd.f32 %v1392_v33, %v1210_v34 }
 0x500   : > { %v1396_v40 = vpop.f32.mrf.mxu1  ;;  %v1314_v41 = vadd.f32 %v1313_v38, %v1214_v36  ;;  %2052 = vtanh.f32 %v1310_v39 }
 0x501   : > { %v1315_v42 = vpop.f32.mrf.mxu0  ;;  %v1397_v51 = vadd.f32 %v1396_v40, %v1214_v36  ;;  %v1433_v40 = vpop.permute.xlu1 %1432 }
 0x502   : > { %v1316_v0 = vadd.f32 %v1315_v42, %v1214_v36  ;;  %v1398_v43 = vpop.f32.mrf.mxu1  ;;  %2054 = vtanh.f32 %v1314_v41 }
 0x503   : > { %v1319_v1 = vpop.f32.mrf.mxu0  ;;  %v1399_v49 = vadd.f32 %v1398_v43, %v1214_v36 }
 0x504   : > { %v1320_v4 = vadd.f32 %v1319_v1, %v1218_v31  ;;  %v1402_v44 = vpop.f32.mrf.mxu1  ;;  %2056 = vtanh.f32 %v1316_v0 }
 0x505   : > { %v1321_v45 = vpop.f32.mrf.mxu0  ;;  %v1403_v46 = vadd.f32 %v1402_v44, %v1218_v31 }
 0x506   : > { %v1322_v47 = vadd.f32 %v1321_v45, %v1218_v31  ;;  %v1404_v48 = vpop.f32.mrf.mxu1  ;;  %2058 = vtanh.f32 %v1320_v4 }
 0x507   : > { %v1405_v50 = vadd.f32 %v1404_v48, %v1218_v31 }
 0x508   : > { %2060 = vtanh.f32 %v1322_v47 }
 0x509   : > { %2062 = vtanh.f32 %v1405_v50 }
 0x50a   : > { %2064 = vtanh.f32 %v1403_v46 }
 0x50b   : > { %2066 = vtanh.f32 %v1399_v49  ;;  %v2051_v54 = vpop.eup %2050 }
 0x50c   : > { %2068 = vtanh.f32 %v1397_v51 }
 0x50d   : > { %2070 = vtanh.f32 %v1393_v52  ;;  %v2053_v55 = vpop.eup %2052  ;;  %v1653_v52 = vpop.permute.xlu0 %1652 }
 0x50e   : > { %2072 = vtanh.f32 %v1391_v53 }
 0x50f   : > { %v2055_v56 = vpop.eup %2054 }
 0x511   : > { %v2057_v57 = vpop.eup %2056 }
 0x513   : > { %v2059_v58 = vpop.eup %2058 }
 0x515   : > { %v2061_v59 = vpop.eup %2060 }
 0x516   : > { %v2063_v60 = vpop.eup %2062  ;;  %1874 = vmatprep.subr.msk.mxu0 %vm344_vm0, %v2061_v59 }
 0x517   : > { %v2065_v61 = vpop.eup %2064  ;;  %1879 = vmatprep.subr.msk.mxu1 %vm344_vm0, %v2063_v60  ;;  %1875 = vmatpush1.msk.msra.mxu0 %vm344_vm0, %v2059_v58 }
 0x518   : > { %v2067_v62 = vpop.eup %2066  ;;  %1880 = vmatpush1.msk.msra.mxu1 %vm344_vm0, %v2065_v61  ;;  %1484 = vmatprep.subr.mxu0 %v2057_v57 }
 0x519   : > { %v2069_v2 = vpop.eup %2068  ;;  %1567 = vmatprep.subr.mxu1 %v2067_v62  ;;  %1485 = vmatpush1.msra.mxu0 %v2055_v56 }
 0x51a   : > { %v2071_v12 = vpop.eup %2070  ;;  %1568 = vmatpush1.msra.mxu1 %v2069_v2  ;;  %1486 = vmatprep.subr.mxu0 %v2053_v55  ;;  %v1649_v55 = vpop.permute.xlu1 %1648 }
 0x51b   : > { %v2073_v28 = vpop.eup %2072  ;;  %1569 = vmatprep.subr.mxu1 %v2071_v12  ;;  %1487 = vmatpush1.msra.mxu0 %v2051_v54 }
 0x51c   : > { %1570 = vmatpush1.msra.mxu1 %v2073_v28  ;;  %1876 = vmatmul.mubr.msk.f32.vlgmr.msra.gmra.mxu0 %vm334_vm1, %v1871_v7 }
 0x51d   : > { %1881 = vmatmul.mubr.msk.f32.vlgmr.msra.gmra.mxu1 %vm334_vm1, %v1871_v7  ;;  %1526 = vmatprep.mubr.f32.mxu0 %v2112_v6 }
 0x51e   : > { %1609 = vmatprep.mubr.f32.mxu1 %v2112_v6 }
 0x520   : > { %1877 = vmatmul.mubr.msk.f32.gmra.mxu0 %vm334_vm1, %v1872_v29 }
 0x521   : > { %1882 = vmatmul.mubr.msk.f32.gmra.mxu1 %vm334_vm1, %v1872_v29  ;;  %1532 = vmatprep.mubr.f32.mxu0 %v2112_v6 }
 0x522   : > { %1615 = vmatprep.mubr.f32.mxu1 %v2112_v6 }
 0x524   : > { %1878 = vmatmul.mubr.msk.f32.gmra.mxu0 %vm334_vm1, %v1873_v26 }
 0x525   : > { %1883 = vmatmul.mubr.msk.f32.gmra.mxu1 %vm334_vm1, %v1873_v26 }
 0x5dc   : > { %v1522_v25 = vpop.f32.mrf.mxu0 }
 0x5dd   : > { %v1523_v13 = vadd.f32 %v1522_v25, %v1425_v23  ;;  %v1605_v15 = vpop.f32.mrf.mxu1 }
 0x5de   : > { %v1606_v18 = vadd.f32 %v1605_v15, %v1425_v23  ;;  %v1524_v21 = vpop.f32.mrf.mxu0 }
 0x5df   : > { %2074 = vtanh.f32 %v1523_v13  ;;  %v1525_v31 = vadd.f32 %v1524_v21, %v1425_v23  ;;  %v1607_v32 = vpop.f32.mrf.mxu1 }
 0x5e0   : > { %2076 = vtanh.f32 %v1606_v18  ;;  %v1608_v34 = vadd.f32 %v1607_v32, %v1425_v23  ;;  %v1528_v35 = vpop.f32.mrf.mxu0  ;;  %v1657_v23 = vpop.permute.xlu1 %1656 }
 0x5e1   : > { %2078 = vtanh.f32 %v1525_v31  ;;  %v1529_v22 = vadd.f32 %v1528_v35, %v1429_v30  ;;  %v1611_v6 = vpop.f32.mrf.mxu1 }
 0x5e2   : > { %2080 = vtanh.f32 %v1608_v34  ;;  %v1612_v33 = vadd.f32 %v1611_v6, %v1429_v30  ;;  %v1530_v36 = vpop.f32.mrf.mxu0 }
 0x5e3   : > { %2082 = vtanh.f32 %v1529_v22  ;;  %v1531_v37 = vadd.f32 %v1530_v36, %v1429_v30  ;;  %v1613_v38 = vpop.f32.mrf.mxu1 }
 0x5e4   : > { %2084 = vtanh.f32 %v1612_v33  ;;  %v1614_v39 = vadd.f32 %v1613_v38, %v1429_v30  ;;  %v1534_v41 = vpop.f32.mrf.mxu0 }
 0x5e5   : > { %2086 = vtanh.f32 %v1531_v37  ;;  %v1535_v42 = vadd.f32 %v1534_v41, %v1433_v40  ;;  %v1617_v0 = vpop.f32.mrf.mxu1 }
 0x5e6   : > { %2088 = vtanh.f32 %v1614_v39  ;;  %v1618_v43 = vadd.f32 %v1617_v0, %v1433_v40  ;;  %v1536_v1 = vpop.f32.mrf.mxu0 }
 0x5e7   : > { %2090 = vtanh.f32 %v1535_v42  ;;  %v1537_v4 = vadd.f32 %v1536_v1, %v1433_v40  ;;  %v1619_v44 = vpop.f32.mrf.mxu1 }
 0x5e8   : > { %2092 = vtanh.f32 %v1618_v43  ;;  %v1620_v45 = vadd.f32 %v1619_v44, %v1433_v40 }
 0x5e9   : > { %2094 = vtanh.f32 %v1537_v4 }
 0x5ea   : > { %2096 = vtanh.f32 %v1620_v45  ;;  %v2121_v45 = vmov 1966171168  }
 0x5ec   : > { %v2075_v46 = vpop.eup %2074 }
 0x5ed   : > { %v2077_v47 = vpop.eup %2076  ;;  %v1634_v56 = vadd.f32 %v2075_v46, %v2432_v27  ;;  %v1723_v46 = vunpack.c.l.s4 %v2121_v45 }
 0x5ee   : > { %v2079_v48 = vpop.eup %2078  ;;  %v1636_v59 = vadd.f32 %v2077_v47, %v2440_v24 }
 0x5ef   : > { %v2081_v49 = vpop.eup %2080  ;;  %v1635_v62 = vadd.f32 %v2079_v48, %v2424_v19  ;;  %v1659_v26 = vmul.f32 %v1649_v55, %v1634_v56 }
 0x5f0   : > { %v2083_v50 = vpop.eup %2082 }
 0x5f1   : > { %v2085_v51 = vpop.eup %2084  ;;  %v1638_v53 = vadd.f32 %v2083_v50, %v2415_v16  ;;  %v1637_v16 = vadd.f32 %v2081_v49, %v2429_v20 }
 0x5f2   : > { %v2087_v54 = vpop.eup %2086  ;;  %v1640_v57 = vadd.f32 %v2085_v51, %v2421_v17 }
 0x5f3   : > { %v2089_v58 = vpop.eup %2088  ;;  %v1639_v60 = vadd.f32 %v2087_v54, %v2405_v11  ;;  %v1663_v7 = vmul.f32 %v1653_v52, %v1638_v53  ;;  %v1661_v11 = vmul.f32 %v1649_v55, %v1636_v59  ;;  %v1662_v30 = vmul.f32 %v1649_v55, %v1637_v16 }
 0x5f4   : > { %v2091_v61 = vpop.eup %2090  ;;  %v1641_v2 = vadd.f32 %v2089_v58, %v2412_v14  ;;  %v1665_v28 = vmul.f32 %v1653_v52, %v1640_v57  ;;  %v1660_v14 = vmul.f32 %v1649_v55, %v1635_v62  ;;  %v1724_v55 = vunpack.c.0.s8 %v1723_v46  ;;  %v1710_v58 = vpop.permute.xlu1 %1709 }
 0x5f5   : > { %v2093_v12 = vpop.eup %2092  ;;  %v1642_v29 = vadd.f32 %v2091_v61, %v2397_v5  ;;  %v1664_v17 = vmul.f32 %v1653_v52, %v1639_v60  ;;  %v1671_v18 = vadd.f32 %v1663_v7, %v1659_v26 }
 0x5f6   : > { %v2095_v27 = vpop.eup %2094  ;;  %v1644_v24 = vadd.f32 %v2093_v12, %v2402_v10  ;;  %v1666_v13 = vmul.f32 %v1653_v52, %v1641_v2  ;;  %v1689_v31 = vadd.f32 %v1665_v28, %v1661_v11  ;;  %v1727_v2 = vsub.s32 %v1724_v55, %v2185_v9 }
 0x5f7   : > { %v2097_v25 = vpop.eup %2096  ;;  %v1643_v19 = vadd.f32 %v2095_v27, %v2391_v63  ;;  %v1667_v15 = vmul.f32 %v1657_v23, %v1642_v29  ;;  %v1680_v34 = vadd.f32 %v1664_v17, %v1660_v14 }
 0x5f8   : > { %v1645_v21 = vadd.f32 %v2097_v25, %v2394_v3  ;;  %v1669_v20 = vmul.f32 %v1657_v23, %v1644_v24  ;;  %v1698_v6 = vadd.f32 %v1666_v13, %v1662_v30 }
 0x5f9   : > { %v1668_v5 = vmul.f32 %v1657_v23, %v1643_v19  ;;  %v1672_v32 = vsel %vm344_vm0, %v1667_v15, 0.0 }
 0x5fa   : > { %v1670_v35 = vmul.f32 %v1657_v23, %v1645_v21  ;;  %v1673_v22 = vadd.f32 %v1672_v32, %v1671_v18  ;;  %v1690_v10 = vsel %vm344_vm0, %v1669_v20, 0.0 }
 0x5fb   : > { %v1681_v33 = vsel %vm344_vm0, %v1668_v5, 0.0  ;;  %v1691_v63 = vadd.f32 %v1690_v10, %v1689_v31 }
 0x5fc   : > { %v1674_v36 = vrot.slane %v1673_v22, 4  ;;  %v1682_v37 = vadd.f32 %v1681_v33, %v1680_v34  ;;  %v1699_v38 = vsel %vm344_vm0, %v1670_v35, 0.0 }
 0x5fd   : > { %v1692_v3 = vrot.slane %v1691_v63, 4  ;;  %v1700_v39 = vadd.f32 %v1699_v38, %v1698_v6 }
 0x5fe   : > { %v1683_v40 = vrot.slane %v1682_v37, 4  ;;  %v1675_v41 = vadd.f32 %v1674_v36, %v1673_v22 }
 0x5ff   : > { %v1701_v42 = vrot.slane %v1700_v39, 4  ;;  %v1693_v0 = vadd.f32 %v1692_v3, %v1691_v63 }
 0x600   : > { %v1676_v43 = vrot.slane %v1675_v41, 2  ;;  %v1684_v1 = vadd.f32 %v1683_v40, %v1682_v37 }
 0x601   : > { %v1694_v4 = vrot.slane %v1693_v0, 2  ;;  %v1702_v44 = vadd.f32 %v1701_v42, %v1700_v39 }
 0x602   : > { %v1677_v47 = vadd.f32 %v1676_v43, %v1675_v41  ;;  %v1685_v48 = vrot.slane %v1684_v1, 2 }
 0x603   : > { %v1695_v49 = vadd.f32 %v1694_v4, %v1693_v0  ;;  %v1703_v50 = vrot.slane %v1702_v44, 2 }
 0x604   : > { %v1678_v51 = vrot.slane %v1677_v47, 1  ;;  %v1686_v52 = vadd.f32 %v1685_v48, %v1684_v1 }
 0x605   : > { %v1696_v53 = vrot.slane %v1695_v49, 1  ;;  %v1704_v54 = vadd.f32 %v1703_v50, %v1702_v44 }
 0x606   : > { %v1679_v56 = vadd.f32 %v1678_v51, %v1677_v47  ;;  %v1687_v57 = vrot.slane %v1686_v52, 1 }
 0x607   : > { %v1697_v59 = vadd.f32 %v1696_v53, %v1695_v49  ;;  %v1705_v60 = vrot.slane %v1704_v54, 1 }
 0x608   : > { %v1688_v61 = vadd.f32 %v1687_v57, %v1686_v52  ;;  %v1712_v7 = vadd.f32 %v1710_v58, %v1679_v56 }
 0x609   : > { %v1706_v62 = vadd.f32 %v1705_v60, %v1704_v54  ;;  %v1714_v16 = vadd.f32 %v1710_v58, %v1697_v59 }
 0x60a   : > { %v1713_v12 = vadd.f32 %v1710_v58, %v1688_v61 }
 0x60b   : > { %v1715_v28 = vadd.f32 %v1710_v58, %v1706_v62 }
 0x60c   : > { %v1720_v29 = vcombine.low %v1712_v7, %v1713_v12 }
 0x60d   : > { %v1721_v27 = vcombine.low %v1714_v16, %v1715_v28 }
 0x60e   : > { %v1728_v26 = vrot.slane %v1720_v29, %v1727_v2 }
 0x60f   : > { %v1735_v17 = vrot.slane %v1721_v27, %v1727_v2 }
 0x611   : > { %v1736_v23 = vcombine.low %v1728_v26, %v1735_v17 }
 0x613   : > { %v1743_v24 = vrot.slane %v1736_v23, %v1727_v2 }
 0x615   : > { %1749 = vst.msk [vmem:[%s170_s21] sm:$0xf] %vm1747_vm2, %v1743_v24 }
 0x616 PF: > { %s13_s12 = sadd.s32 1, %s2107_s12  }
 0x617   : > { %p10_p4 = scmp.ge.s32.totalorder %s13_s12, 4  }
 0x619   :  { %12 = sbr.rel (!%p10_p4) target bundleno = 1 (0x1), region = 68 }

</bundles_post_ra>
